<compile_context>
chip_gen: v5e
topology: v5e:2x2
jax: 0.10.0
libtpu: 0.0.40
codegen_flags: <defaults>
</compile_context>

<pallas_src>
import functools

import jax
import jax.numpy as jnp
from jax import lax
from jax.experimental import pallas as pl
from jax.experimental.pallas import tpu as pltpu


# ----------------------------------------------------------------------------
# Fused kernel: whole ConvBlock for one image per grid step.
# Internal activation layout: (C, H*W) f32, lane index = y*W + x.
# ----------------------------------------------------------------------------
def _conv_block_kernel(x_ref, w1_ref, b1_ref, s1_ref, t1_ref,
                       w2_ref, b2_ref, s2_ref, t2_ref,
                       o_ref, pad_ref, *, C1, C2, H, W, K, P):
    f32 = jnp.float32
    L = H * W
    OFF = P * W + P          # scratch lane holding pixel (y=0, x=0)

    # x-coordinate of every flat lane; only row-wrap along x needs masking
    # (left/right zero padding).  Top/bottom zero padding comes from the
    # physically zeroed scratch lanes.
    xx = lax.broadcasted_iota(jnp.int32, (1, L), 1) % W

    # Zero the padded line buffer once per grid step; the interior stores
    # below never touch the border lanes, so they stay zero for both convs.
    pad_ref[...] = jnp.zeros(pad_ref.shape, f32)

    def conv_relu_bn(act, C, w_ref, b_ref, s_ref, t_ref):
        # act: (C, L) f32 -> (Cout, L) f32.  Single im2col contraction.
        pad_ref[pl.ds(0, C), pl.ds(OFF, L)] = act
        taps = []
        for kh in range(K):
            for kw in range(K):
                # Static window load == tap shift; no in-vreg concat/reshape
                # relayouts and no roll-direction ambiguity.
                win = pad_ref[pl.ds(0, C), pl.ds(kh * W + kw, L)]
                dx = kw - P
                if dx != 0:
                    valid = (xx + dx >= 0) & (xx + dx < W)
                    win = jnp.where(valid, win, 0.0)
                taps.append(win)
        # (K*K*C, L): 8-sublane-aligned concat in f32, then one pack to bf16.
        patches = jnp.concatenate(taps, axis=0).astype(w_ref.dtype)
        acc = jnp.dot(w_ref[...], patches, preferred_element_type=f32)
        acc = acc + b_ref[...]                 # conv bias (Cout, 1)
        acc = jnp.maximum(acc, 0.0)            # act_layer = ReLU
        return acc * s_ref[...] + t_ref[...]   # BatchNorm (eval, folded)

    # conv1 -> ReLU -> BN1, then conv2 -> ReLU -> BN2; nothing leaves VMEM.
    a1 = conv_relu_bn(x_ref[0], C1, w1_ref, b1_ref, s1_ref, t1_ref)
    a2 = conv_relu_bn(a1, C2, w2_ref, b2_ref, s2_ref, t2_ref)

    # ---- MaxPool2d((2, 2)) -------------------------------------------------
    # Three shifted window loads from the scratch + VPU max.  The 2x2 window
    # max for pool cell (py, px) lands on lane (2*py)*W + 2*px; the strided
    # pick of those corner lanes is done by the wrapper (free at this size).
    co = a2.shape[0]
    pad_ref[pl.ds(0, co), pl.ds(0, L)] = a2
    m = a2
    for off in (1, W, W + 1):
        m = jnp.maximum(m, pad_ref[pl.ds(0, co), pl.ds(off, L)])

    # Dropout(p) in eval mode is the identity.
    # TODO(synk): training-mode dropout (pltpu.prng_random_bits mask) and
    # batch-statistics BatchNorm are not implemented.
    o_ref[0] = m.astype(o_ref.dtype)


def _fold_bn(gamma, beta, mean, var, eps):
    scale = gamma / jnp.sqrt(var + eps)
    return scale, beta - mean * scale


# ----------------------------------------------------------------------------
# Wrapper: NCHW in, NCHW out.  Only tiny (KiB-scale) relayouts at the boundary.
# ----------------------------------------------------------------------------
def conv_block_forward(x_nchw, params, *, stride, padding, training=False):
    if training:
        raise NotImplementedError(
            "Pallas ConvBlock kernel implements eval-mode BatchNorm (running "
            "stats) and identity dropout only.")

    N, Cin, H, W = x_nchw.shape
    w1, w2 = params["w1"], params["w2"]
    Cout, _, KH, KW = w1.shape
    assert KH == KW and stride == 1 and padding == (KH - 1) // 2, \
        "kernel is specialised to stride-1 'same' convolutions"
    assert H % 2 == 0 and W % 2 == 0, "MaxPool2d((2,2)) path needs even H, W"
    K, P = KH, padding
    L = H * W
    PH, PW = H // 2, W // 2

    # Pad in-channels to the f32 sublane tile (8) so every im2col tap block is
    # tile-aligned; zero channels x zero weights contribute exactly 0.
    Cpad = max(8, ((Cin + 7) // 8) * 8)
    x_flat = x_nchw.reshape(N, Cin, L).astype(jnp.float32)
    x_flat = jnp.pad(x_flat, ((0, 0), (0, Cpad - Cin), (0, 0)))

    def pack_w(w, cin_to):
        # PyTorch OIHW -> (Cout, K*K*cin_to) bf16 with K ordered (kh, kw, ci),
        # matching the kernel's tap-major im2col rows.
        co, ci, kh, kw = w.shape
        w = jnp.transpose(w, (0, 2, 3, 1))
        w = jnp.pad(w, ((0, 0), (0, 0), (0, 0), (0, cin_to - ci)))
        return w.reshape(co, kh * kw * cin_to).astype(jnp.bfloat16)

    w1_p = pack_w(w1, Cpad)
    w2_p = pack_w(w2, Cout)

    eps = params["bn_eps"]
    s1, t1 = _fold_bn(params["bn1_gamma"], params["bn1_beta"],
                      params["bn1_mean"], params["bn1_var"], eps)
    s2, t2 = _fold_bn(params["bn2_gamma"], params["bn2_beta"],
                      params["bn2_mean"], params["bn2_var"], eps)
    col = lambda v: v.reshape(-1, 1).astype(jnp.float32)

    CS = max(Cpad, Cout)
    SPAD = ((2 * P + (H + 2 * P) * W + 127) // 128) * 128   # padded line buffer

    # Light VMEM guard for the single-block-per-image design (v7x: 64 MiB
    # physical / 32 MiB scoped default).
    vmem_bytes = (2 * (Cpad + 2 * Cout) * L * 4        # double-buffered blocks
                  + CS * SPAD * 4                      # scratch
                  + 2 * (w1_p.size + w2_p.size) * 2 + 4096)
    assert vmem_bytes < 16 * 1024 * 1024, "problem too large for one block"

    kernel = functools.partial(_conv_block_kernel, C1=Cpad, C2=Cout,
                               H=H, W=W, K=K, P=P)

    flops = 2 * N * Cout * L * (K * K * Cpad + K * K * Cout)
    bytes_accessed = (x_flat.size * 4 + N * Cout * L * 4
                      + (w1_p.size + w2_p.size) * 2 + 8 * Cout * 4)

    broadcast2 = lambda n: (0, 0)
    out_full = pl.pallas_call(
        kernel,
        out_shape=jax.ShapeDtypeStruct((N, Cout, L), jnp.float32),
        grid=(N,),                               # one image per step / per core
        in_specs=[
            pl.BlockSpec((1, Cpad, L), lambda n: (n, 0, 0)),
            pl.BlockSpec((Cout, K * K * Cpad), broadcast2),
            pl.BlockSpec((Cout, 1), broadcast2),
            pl.BlockSpec((Cout, 1), broadcast2),
            pl.BlockSpec((Cout, 1), broadcast2),
            pl.BlockSpec((Cout, K * K * Cout), broadcast2),
            pl.BlockSpec((Cout, 1), broadcast2),
            pl.BlockSpec((Cout, 1), broadcast2),
            pl.BlockSpec((Cout, 1), broadcast2),
        ],
        out_specs=pl.BlockSpec((1, Cout, L), lambda n: (n, 0, 0)),
        scratch_shapes=[pltpu.VMEM((CS, SPAD), jnp.float32)],
        compiler_params=pltpu.CompilerParams(
            dimension_semantics=("parallel",)),   # v7x: both TensorCores busy
        cost_estimate=pl.CostEstimate(flops=flops, transcendentals=0,
                                      bytes_accessed=bytes_accessed),
    )(x_flat, w1_p, col(params["b1"]), col(s1), col(t1),
      w2_p, col(params["b2"]), col(s2), col(t2))

    # Free wrapper-side ops on a 16 KiB result: un-flatten and pick the pool
    # window corners (the kernel leaves the 2x2 max on the even (y, x) lanes).
    out = out_full.reshape(N, Cout, H, W)[:, :, ::2, ::2]
    assert out.shape == (N, Cout, PH, PW)
    return out


# ----------------------------------------------------------------------------
# Deterministic synthetic parameters (PyTorch layouts) and pure-JAX reference.
# ----------------------------------------------------------------------------
def init_conv_block_params(key, in_channels, out_channels, kernel_size,
                           bn_eps=1e-5):
    ks = jax.random.split(key, 12)

    def conv_params(kw_key, kb_key, cin, cout, k):
        fan_in = cin * k * k
        bound = 1.0 / jnp.sqrt(fan_in)
        w = jax.random.uniform(kw_key, (cout, cin, k, k), jnp.float32,
                               -bound, bound)                  # PyTorch OIHW
        b = jax.random.uniform(kb_key, (cout,), jnp.float32, -bound, bound)
        return w, b

    def bn_params(g_key, b_key, m_key, v_key, c):
        gamma = 1.0 + 0.1 * jax.random.normal(g_key, (c,), jnp.float32)
        beta = 0.1 * jax.random.normal(b_key, (c,), jnp.float32)
        mean = 0.1 * jax.random.normal(m_key, (c,), jnp.float32)
        var = 0.5 + jnp.abs(jax.random.normal(v_key, (c,), jnp.float32))
        return gamma, beta, mean, var

    w1, b1 = conv_params(ks[0], ks[1], in_channels, out_channels, kernel_size)
    g1, be1, m1, v1 = bn_params(ks[2], ks[3], ks[4], ks[5], out_channels)
    w2, b2 = conv_params(ks[6], ks[7], out_channels, out_channels, kernel_size)
    g2, be2, m2, v2 = bn_params(ks[8], ks[9], ks[10], ks[11], out_channels)
    return dict(w1=w1, b1=b1, bn1_gamma=g1, bn1_beta=be1, bn1_mean=m1, bn1_var=v1,
                w2=w2, b2=b2, bn2_gamma=g2, bn2_beta=be2, bn2_mean=m2, bn2_var=v2,
                bn_eps=bn_eps)


def _reference_forward(x, params, *, stride, padding,
                       matmul_dtype=jnp.bfloat16):
    # Pure-JAX reference mirroring the kernel's operand precision (bf16 conv
    # operands, f32 accumulation + f32 epilogue) so the comparison stays tight.
    eps = params["bn_eps"]
    s1, t1 = _fold_bn(params["bn1_gamma"], params["bn1_beta"],
                      params["bn1_mean"], params["bn1_var"], eps)
    s2, t2 = _fold_bn(params["bn2_gamma"], params["bn2_beta"],
                      params["bn2_mean"], params["bn2_var"], eps)

    def conv_relu_bn(y, w, b, scale, shift):
        y = lax.conv_general_dilated(
            y.astype(matmul_dtype), w.astype(matmul_dtype),
            window_strides=(stride, stride),
            padding=((padding, padding), (padding, padding)),
            dimension_numbers=("NCHW", "OIHW", "NCHW"),
            preferred_element_type=jnp.float32)
        y = y + b[None, :, None, None]
        y = jnp.maximum(y, 0.0)
        return y * scale[None, :, None, None] + shift[None, :, None, None]

    y = conv_relu_bn(x.astype(jnp.float32), params["w1"], params["b1"], s1, t1)
    y = conv_relu_bn(y, params["w2"], params["b2"], s2, t2)
    N, C, H, W = y.shape
    y = y.reshape(N, C, H // 2, 2, W // 2, 2).max(axis=(3, 5))
    return y  # dropout (eval) = identity


if __name__ == "__main__":
    # ConvBlock(in_channels=4, out_channels=8, kernel_size=3, stride=1,
    #           padding=1, act_layer=nn.ReLU, dropout=0.1)  [eval mode]
    N, Cin, H, W = 2, 4, 16, 16
    Cout, K, STRIDE, PAD = 8, 3, 1, 1

    key = jax.random.PRNGKey(0)
    k_x, k_p = jax.random.split(key)
    x = jax.random.normal(k_x, (N, Cin, H, W), jnp.float32)
    params = init_conv_block_params(k_p, Cin, Cout, K)

    out = conv_block_forward(x, params, stride=STRIDE, padding=PAD)
    out = jax.block_until_ready(out)

    assert out.shape == (N, Cout, H // 2, W // 2), out.shape
    assert bool(jnp.all(jnp.isfinite(out)))

    ref = _reference_forward(x, params, stride=STRIDE, padding=PAD)
    max_err = float(jnp.max(jnp.abs(out - ref)))
    # Tolerance covers bf16 operand rounding interacting with independent f32
    # accumulation orders (typical max err ~1e-4); layout bugs are O(0.1+).
    assert jnp.allclose(out, ref, atol=1e-2, rtol=1e-3), max_err

    print("KERNEL_OK")
</pallas_src>

<mosaic_0001>
module attributes {stable_mosaic.version = 11 : i64} {
  func.func @_conv_block_kernel(%arg0: i32, %arg1: memref<1x8x256xf32, #tpu.memory_space<vmem>>, %arg2: memref<8x72xbf16, #tpu.memory_space<vmem>>, %arg3: memref<8x1xf32, #tpu.memory_space<vmem>>, %arg4: memref<8x1xf32, #tpu.memory_space<vmem>>, %arg5: memref<8x1xf32, #tpu.memory_space<vmem>>, %arg6: memref<8x72xbf16, #tpu.memory_space<vmem>>, %arg7: memref<8x1xf32, #tpu.memory_space<vmem>>, %arg8: memref<8x1xf32, #tpu.memory_space<vmem>>, %arg9: memref<8x1xf32, #tpu.memory_space<vmem>>, %arg10: memref<1x8x256xf32, #tpu.memory_space<vmem>>, %arg11: memref<8x384xf32, #tpu.memory_space<vmem>>) attributes {dimension_semantics = [#tpu.dimension_semantics<parallel>], iteration_bounds = array<i64: 2>, scalar_prefetch = 0 : i64, scratch_operands = 1 : i64, tpu.core_type = #tpu.core_type<tc>, window_params = [{transform_indices = @transform_0, window_bounds = array<i64: 1, 8, 256>}, {pipeline_mode = #tpu.pipeline_mode<synchronous>, transform_indices = @transform_1, window_bounds = array<i64: 8, 72>}, {pipeline_mode = #tpu.pipeline_mode<synchronous>, transform_indices = @transform_2, window_bounds = array<i64: 8, 1>}, {pipeline_mode = #tpu.pipeline_mode<synchronous>, transform_indices = @transform_3, window_bounds = array<i64: 8, 1>}, {pipeline_mode = #tpu.pipeline_mode<synchronous>, transform_indices = @transform_4, window_bounds = array<i64: 8, 1>}, {pipeline_mode = #tpu.pipeline_mode<synchronous>, transform_indices = @transform_5, window_bounds = array<i64: 8, 72>}, {pipeline_mode = #tpu.pipeline_mode<synchronous>, transform_indices = @transform_6, window_bounds = array<i64: 8, 1>}, {pipeline_mode = #tpu.pipeline_mode<synchronous>, transform_indices = @transform_7, window_bounds = array<i64: 8, 1>}, {pipeline_mode = #tpu.pipeline_mode<synchronous>, transform_indices = @transform_8, window_bounds = array<i64: 8, 1>}, {transform_indices = @transform_9, window_bounds = array<i64: 1, 8, 256>}]} {
    %0 = tpu.iota {dimensions = array<i32: 1>} : vector<1x256xi32>
    %c16_i32 = arith.constant 16 : i32
    %c0_i32 = arith.constant 0 : i32
    %1 = arith.cmpi eq, %c16_i32, %c0_i32 : i32
    %c1_i32 = arith.constant 1 : i32
    %2 = arith.select %1, %c1_i32, %c16_i32 : i32
    %3 = vector.broadcast %2 : i32 to vector<1x256xi32>
    %4 = arith.remsi %0, %3 : vector<1x256xi32>
    %c0_i32_0 = arith.constant 0 : i32
    %5 = vector.broadcast %c0_i32_0 : i32 to vector<1x256xi32>
    %6 = arith.cmpi ne, %4, %5 : vector<1x256xi32>
    %c0_i32_1 = arith.constant 0 : i32
    %7 = vector.broadcast %c0_i32_1 : i32 to vector<1x256xi32>
    %8 = arith.cmpi slt, %4, %7 : vector<1x256xi32>
    %c0_i32_2 = arith.constant 0 : i32
    %9 = arith.cmpi slt, %2, %c0_i32_2 : i32
    %10 = vector.broadcast %9 : i1 to vector<1x256xi1>
    %11 = vector.broadcast %10 : vector<1x256xi1> to vector<1x256xi1>
    %12 = arith.xori %8, %11 : vector<1x256xi1>
    %13 = arith.andi %12, %6 : vector<1x256xi1>
    %14 = vector.broadcast %2 : i32 to vector<1x256xi32>
    %15 = arith.addi %4, %14 : vector<1x256xi32>
    %16 = arith.select %13, %15, %4 : vector<1x256xi1>, vector<1x256xi32>
    %cst = arith.constant 0.000000e+00 : f32
    %17 = vector.broadcast %cst : f32 to vector<8x384xf32>
    %c0 = arith.constant 0 : index
    %c0_3 = arith.constant 0 : index
    %18 = vector.load %arg11[%c0, %c0_3] : memref<8x384xf32, #tpu.memory_space<vmem>>, vector<8x384xf32>
    tpu.vector_store %arg11[%c0, %c0_3], %17 {strides = array<i32>} : memref<8x384xf32, #tpu.memory_space<vmem>>, vector<8x384xf32>,
    %c0_4 = arith.constant 0 : index
    %c0_5 = arith.constant 0 : index
    %c0_6 = arith.constant 0 : index
    %19 = vector.load %arg1[%c0_4, %c0_5, %c0_6] : memref<1x8x256xf32, #tpu.memory_space<vmem>>, vector<1x8x256xf32>
    %20 = vector.shape_cast %19 : vector<1x8x256xf32> to vector<8x256xf32>
    %c0_7 = arith.constant 0 : index
    %c17 = arith.constant 17 : index
    %21 = vector.load %arg11[%c0_7, %c17] : memref<8x384xf32, #tpu.memory_space<vmem>>, vector<8x256xf32>
    tpu.vector_store %arg11[%c0_7, %c17], %20 {strides = array<i32>} : memref<8x384xf32, #tpu.memory_space<vmem>>, vector<8x256xf32>,
    %c0_8 = arith.constant 0 : index
    %c0_9 = arith.constant 0 : index
    %22 = vector.load %arg11[%c0_8, %c0_9] : memref<8x384xf32, #tpu.memory_space<vmem>>, vector<8x256xf32>
    %c-1_i32 = arith.constant -1 : i32
    %23 = vector.broadcast %c-1_i32 : i32 to vector<1x256xi32>
    %24 = arith.addi %16, %23 : vector<1x256xi32>
    %c0_i32_10 = arith.constant 0 : i32
    %25 = vector.broadcast %c0_i32_10 : i32 to vector<1x256xi32>
    %26 = arith.cmpi sge, %24, %25 : vector<1x256xi32>
    %c-1_i32_11 = arith.constant -1 : i32
    %27 = vector.broadcast %c-1_i32_11 : i32 to vector<1x256xi32>
    %28 = arith.addi %16, %27 : vector<1x256xi32>
    %c16_i32_12 = arith.constant 16 : i32
    %29 = vector.broadcast %c16_i32_12 : i32 to vector<1x256xi32>
    %30 = arith.cmpi slt, %28, %29 : vector<1x256xi32>
    %31 = arith.andi %26, %30 : vector<1x256xi1>
    %cst_13 = arith.constant 0.000000e+00 : f32
    %32 = vector.shape_cast %31 : vector<1x256xi1> to vector<1x256xi1>
    %33 = vector.broadcast %32 : vector<1x256xi1> to vector<8x256xi1>
    %34 = vector.broadcast %cst_13 : f32 to vector<8x256xf32>
    %35 = arith.select %33, %22, %34 : vector<8x256xi1>, vector<8x256xf32>
    %c0_14 = arith.constant 0 : index
    %c1 = arith.constant 1 : index
    %36 = vector.load %arg11[%c0_14, %c1] : memref<8x384xf32, #tpu.memory_space<vmem>>, vector<8x256xf32>
    %c0_15 = arith.constant 0 : index
    %c2 = arith.constant 2 : index
    %37 = vector.load %arg11[%c0_15, %c2] : memref<8x384xf32, #tpu.memory_space<vmem>>, vector<8x256xf32>
    %c1_i32_16 = arith.constant 1 : i32
    %38 = vector.broadcast %c1_i32_16 : i32 to vector<1x256xi32>
    %39 = arith.addi %16, %38 : vector<1x256xi32>
    %c0_i32_17 = arith.constant 0 : i32
    %40 = vector.broadcast %c0_i32_17 : i32 to vector<1x256xi32>
    %41 = arith.cmpi sge, %39, %40 : vector<1x256xi32>
    %c1_i32_18 = arith.constant 1 : i32
    %42 = vector.broadcast %c1_i32_18 : i32 to vector<1x256xi32>
    %43 = arith.addi %16, %42 : vector<1x256xi32>
    %c16_i32_19 = arith.constant 16 : i32
    %44 = vector.broadcast %c16_i32_19 : i32 to vector<1x256xi32>
    %45 = arith.cmpi slt, %43, %44 : vector<1x256xi32>
    %46 = arith.andi %41, %45 : vector<1x256xi1>
    %cst_20 = arith.constant 0.000000e+00 : f32
    %47 = vector.shape_cast %46 : vector<1x256xi1> to vector<1x256xi1>
    %48 = vector.broadcast %47 : vector<1x256xi1> to vector<8x256xi1>
    %49 = vector.broadcast %cst_20 : f32 to vector<8x256xf32>
    %50 = arith.select %48, %37, %49 : vector<8x256xi1>, vector<8x256xf32>
    %c0_21 = arith.constant 0 : index
    %c16 = arith.constant 16 : index
    %51 = vector.load %arg11[%c0_21, %c16] : memref<8x384xf32, #tpu.memory_space<vmem>>, vector<8x256xf32>
    %c-1_i32_22 = arith.constant -1 : i32
    %52 = vector.broadcast %c-1_i32_22 : i32 to vector<1x256xi32>
    %53 = arith.addi %16, %52 : vector<1x256xi32>
    %c0_i32_23 = arith.constant 0 : i32
    %54 = vector.broadcast %c0_i32_23 : i32 to vector<1x256xi32>
    %55 = arith.cmpi sge, %53, %54 : vector<1x256xi32>
    %c-1_i32_24 = arith.constant -1 : i32
    %56 = vector.broadcast %c-1_i32_24 : i32 to vector<1x256xi32>
    %57 = arith.addi %16, %56 : vector<1x256xi32>
    %c16_i32_25 = arith.constant 16 : i32
    %58 = vector.broadcast %c16_i32_25 : i32 to vector<1x256xi32>
    %59 = arith.cmpi slt, %57, %58 : vector<1x256xi32>
    %60 = arith.andi %55, %59 : vector<1x256xi1>
    %cst_26 = arith.constant 0.000000e+00 : f32
    %61 = vector.shape_cast %60 : vector<1x256xi1> to vector<1x256xi1>
    %62 = vector.broadcast %61 : vector<1x256xi1> to vector<8x256xi1>
    %63 = vector.broadcast %cst_26 : f32 to vector<8x256xf32>
    %64 = arith.select %62, %51, %63 : vector<8x256xi1>, vector<8x256xf32>
    %c0_27 = arith.constant 0 : index
    %c17_28 = arith.constant 17 : index
    %65 = vector.load %arg11[%c0_27, %c17_28] : memref<8x384xf32, #tpu.memory_space<vmem>>, vector<8x256xf32>
    %c0_29 = arith.constant 0 : index
    %c18 = arith.constant 18 : index
    %66 = vector.load %arg11[%c0_29, %c18] : memref<8x384xf32, #tpu.memory_space<vmem>>, vector<8x256xf32>
    %c1_i32_30 = arith.constant 1 : i32
    %67 = vector.broadcast %c1_i32_30 : i32 to vector<1x256xi32>
    %68 = arith.addi %16, %67 : vector<1x256xi32>
    %c0_i32_31 = arith.constant 0 : i32
    %69 = vector.broadcast %c0_i32_31 : i32 to vector<1x256xi32>
    %70 = arith.cmpi sge, %68, %69 : vector<1x256xi32>
    %c1_i32_32 = arith.constant 1 : i32
    %71 = vector.broadcast %c1_i32_32 : i32 to vector<1x256xi32>
    %72 = arith.addi %16, %71 : vector<1x256xi32>
    %c16_i32_33 = arith.constant 16 : i32
    %73 = vector.broadcast %c16_i32_33 : i32 to vector<1x256xi32>
    %74 = arith.cmpi slt, %72, %73 : vector<1x256xi32>
    %75 = arith.andi %70, %74 : vector<1x256xi1>
    %cst_34 = arith.constant 0.000000e+00 : f32
    %76 = vector.shape_cast %75 : vector<1x256xi1> to vector<1x256xi1>
    %77 = vector.broadcast %76 : vector<1x256xi1> to vector<8x256xi1>
    %78 = vector.broadcast %cst_34 : f32 to vector<8x256xf32>
    %79 = arith.select %77, %66, %78 : vector<8x256xi1>, vector<8x256xf32>
    %c0_35 = arith.constant 0 : index
    %c32 = arith.constant 32 : index
    %80 = vector.load %arg11[%c0_35, %c32] : memref<8x384xf32, #tpu.memory_space<vmem>>, vector<8x256xf32>
    %c-1_i32_36 = arith.constant -1 : i32
    %81 = vector.broadcast %c-1_i32_36 : i32 to vector<1x256xi32>
    %82 = arith.addi %16, %81 : vector<1x256xi32>
    %c0_i32_37 = arith.constant 0 : i32
    %83 = vector.broadcast %c0_i32_37 : i32 to vector<1x256xi32>
    %84 = arith.cmpi sge, %82, %83 : vector<1x256xi32>
    %c-1_i32_38 = arith.constant -1 : i32
    %85 = vector.broadcast %c-1_i32_38 : i32 to vector<1x256xi32>
    %86 = arith.addi %16, %85 : vector<1x256xi32>
    %c16_i32_39 = arith.constant 16 : i32
    %87 = vector.broadcast %c16_i32_39 : i32 to vector<1x256xi32>
    %88 = arith.cmpi slt, %86, %87 : vector<1x256xi32>
    %89 = arith.andi %84, %88 : vector<1x256xi1>
    %cst_40 = arith.constant 0.000000e+00 : f32
    %90 = vector.shape_cast %89 : vector<1x256xi1> to vector<1x256xi1>
    %91 = vector.broadcast %90 : vector<1x256xi1> to vector<8x256xi1>
    %92 = vector.broadcast %cst_40 : f32 to vector<8x256xf32>
    %93 = arith.select %91, %80, %92 : vector<8x256xi1>, vector<8x256xf32>
    %c0_41 = arith.constant 0 : index
    %c33 = arith.constant 33 : index
    %94 = vector.load %arg11[%c0_41, %c33] : memref<8x384xf32, #tpu.memory_space<vmem>>, vector<8x256xf32>
    %c0_42 = arith.constant 0 : index
    %c34 = arith.constant 34 : index
    %95 = vector.load %arg11[%c0_42, %c34] : memref<8x384xf32, #tpu.memory_space<vmem>>, vector<8x256xf32>
    %c1_i32_43 = arith.constant 1 : i32
    %96 = vector.broadcast %c1_i32_43 : i32 to vector<1x256xi32>
    %97 = arith.addi %16, %96 : vector<1x256xi32>
    %c0_i32_44 = arith.constant 0 : i32
    %98 = vector.broadcast %c0_i32_44 : i32 to vector<1x256xi32>
    %99 = arith.cmpi sge, %97, %98 : vector<1x256xi32>
    %c1_i32_45 = arith.constant 1 : i32
    %100 = vector.broadcast %c1_i32_45 : i32 to vector<1x256xi32>
    %101 = arith.addi %16, %100 : vector<1x256xi32>
    %c16_i32_46 = arith.constant 16 : i32
    %102 = vector.broadcast %c16_i32_46 : i32 to vector<1x256xi32>
    %103 = arith.cmpi slt, %101, %102 : vector<1x256xi32>
    %104 = arith.andi %99, %103 : vector<1x256xi1>
    %cst_47 = arith.constant 0.000000e+00 : f32
    %105 = vector.shape_cast %104 : vector<1x256xi1> to vector<1x256xi1>
    %106 = vector.broadcast %105 : vector<1x256xi1> to vector<8x256xi1>
    %107 = vector.broadcast %cst_47 : f32 to vector<8x256xf32>
    %108 = arith.select %106, %95, %107 : vector<8x256xi1>, vector<8x256xf32>
    %109 = tpu.concatenate %35, %36, %50, %64, %65, %79, %93, %94, %108 in 0 : vector<8x256xf32>, vector<8x256xf32>, vector<8x256xf32>, vector<8x256xf32>, vector<8x256xf32>, vector<8x256xf32>, vector<8x256xf32>, vector<8x256xf32>, vector<8x256xf32> -> vector<72x256xf32>
    %110 = arith.truncf %109 : vector<72x256xf32> to vector<72x256xbf16>
    %c0_48 = arith.constant 0 : index
    %c0_49 = arith.constant 0 : index
    %111 = vector.load %arg2[%c0_48, %c0_49] : memref<8x72xbf16, #tpu.memory_space<vmem>>, vector<8x72xbf16>
    %cst_50 = arith.constant dense<0.000000e+00> : vector<8x256xf32>
    %112 = tpu.matmul %111, %110, %cst_50 {dimension_numbers = #tpu.dot_dimension_numbers<[1], [0], [0], [1], [0, 0, 1, 1], [], []>} : vector<8x72xbf16>, vector<72x256xbf16>, vector<8x256xf32> -> vector<8x256xf32>
    %c0_51 = arith.constant 0 : index
    %c0_52 = arith.constant 0 : index
    %113 = vector.load %arg3[%c0_51, %c0_52] : memref<8x1xf32, #tpu.memory_space<vmem>>, vector<8x1xf32>
    %114 = vector.broadcast %113 : vector<8x1xf32> to vector<8x256xf32>
    %115 = arith.addf %112, %114 : vector<8x256xf32>
    %cst_53 = arith.constant 0.000000e+00 : f32
    %116 = vector.broadcast %cst_53 : f32 to vector<8x256xf32>
    %117 = arith.maximumf %115, %116 : vector<8x256xf32>
    %c0_54 = arith.constant 0 : index
    %c0_55 = arith.constant 0 : index
    %118 = vector.load %arg4[%c0_54, %c0_55] : memref<8x1xf32, #tpu.memory_space<vmem>>, vector<8x1xf32>
    %119 = vector.broadcast %118 : vector<8x1xf32> to vector<8x256xf32>
    %120 = arith.mulf %117, %119 : vector<8x256xf32>
    %c0_56 = arith.constant 0 : index
    %c0_57 = arith.constant 0 : index
    %121 = vector.load %arg5[%c0_56, %c0_57] : memref<8x1xf32, #tpu.memory_space<vmem>>, vector<8x1xf32>
    %122 = vector.broadcast %121 : vector<8x1xf32> to vector<8x256xf32>
    %123 = arith.addf %120, %122 : vector<8x256xf32>
    %c0_58 = arith.constant 0 : index
    %c17_59 = arith.constant 17 : index
    %124 = vector.load %arg11[%c0_58, %c17_59] : memref<8x384xf32, #tpu.memory_space<vmem>>, vector<8x256xf32>
    tpu.vector_store %arg11[%c0_58, %c17_59], %123 {strides = array<i32>} : memref<8x384xf32, #tpu.memory_space<vmem>>, vector<8x256xf32>,
    %c0_60 = arith.constant 0 : index
    %c0_61 = arith.constant 0 : index
    %125 = vector.load %arg11[%c0_60, %c0_61] : memref<8x384xf32, #tpu.memory_space<vmem>>, vector<8x256xf32>
    %c-1_i32_62 = arith.constant -1 : i32
    %126 = vector.broadcast %c-1_i32_62 : i32 to vector<1x256xi32>
    %127 = arith.addi %16, %126 : vector<1x256xi32>
    %c0_i32_63 = arith.constant 0 : i32
    %128 = vector.broadcast %c0_i32_63 : i32 to vector<1x256xi32>
    %129 = arith.cmpi sge, %127, %128 : vector<1x256xi32>
    %c-1_i32_64 = arith.constant -1 : i32
    %130 = vector.broadcast %c-1_i32_64 : i32 to vector<1x256xi32>
    %131 = arith.addi %16, %130 : vector<1x256xi32>
    %c16_i32_65 = arith.constant 16 : i32
    %132 = vector.broadcast %c16_i32_65 : i32 to vector<1x256xi32>
    %133 = arith.cmpi slt, %131, %132 : vector<1x256xi32>
    %134 = arith.andi %129, %133 : vector<1x256xi1>
    %cst_66 = arith.constant 0.000000e+00 : f32
    %135 = vector.shape_cast %134 : vector<1x256xi1> to vector<1x256xi1>
    %136 = vector.broadcast %135 : vector<1x256xi1> to vector<8x256xi1>
    %137 = vector.broadcast %cst_66 : f32 to vector<8x256xf32>
    %138 = arith.select %136, %125, %137 : vector<8x256xi1>, vector<8x256xf32>
    %c0_67 = arith.constant 0 : index
    %c1_68 = arith.constant 1 : index
    %139 = vector.load %arg11[%c0_67, %c1_68] : memref<8x384xf32, #tpu.memory_space<vmem>>, vector<8x256xf32>
    %c0_69 = arith.constant 0 : index
    %c2_70 = arith.constant 2 : index
    %140 = vector.load %arg11[%c0_69, %c2_70] : memref<8x384xf32, #tpu.memory_space<vmem>>, vector<8x256xf32>
    %c1_i32_71 = arith.constant 1 : i32
    %141 = vector.broadcast %c1_i32_71 : i32 to vector<1x256xi32>
    %142 = arith.addi %16, %141 : vector<1x256xi32>
    %c0_i32_72 = arith.constant 0 : i32
    %143 = vector.broadcast %c0_i32_72 : i32 to vector<1x256xi32>
    %144 = arith.cmpi sge, %142, %143 : vector<1x256xi32>
    %c1_i32_73 = arith.constant 1 : i32
    %145 = vector.broadcast %c1_i32_73 : i32 to vector<1x256xi32>
    %146 = arith.addi %16, %145 : vector<1x256xi32>
    %c16_i32_74 = arith.constant 16 : i32
    %147 = vector.broadcast %c16_i32_74 : i32 to vector<1x256xi32>
    %148 = arith.cmpi slt, %146, %147 : vector<1x256xi32>
    %149 = arith.andi %144, %148 : vector<1x256xi1>
    %cst_75 = arith.constant 0.000000e+00 : f32
    %150 = vector.shape_cast %149 : vector<1x256xi1> to vector<1x256xi1>
    %151 = vector.broadcast %150 : vector<1x256xi1> to vector<8x256xi1>
    %152 = vector.broadcast %cst_75 : f32 to vector<8x256xf32>
    %153 = arith.select %151, %140, %152 : vector<8x256xi1>, vector<8x256xf32>
    %c0_76 = arith.constant 0 : index
    %c16_77 = arith.constant 16 : index
    %154 = vector.load %arg11[%c0_76, %c16_77] : memref<8x384xf32, #tpu.memory_space<vmem>>, vector<8x256xf32>
    %c-1_i32_78 = arith.constant -1 : i32
    %155 = vector.broadcast %c-1_i32_78 : i32 to vector<1x256xi32>
    %156 = arith.addi %16, %155 : vector<1x256xi32>
    %c0_i32_79 = arith.constant 0 : i32
    %157 = vector.broadcast %c0_i32_79 : i32 to vector<1x256xi32>
    %158 = arith.cmpi sge, %156, %157 : vector<1x256xi32>
    %c-1_i32_80 = arith.constant -1 : i32
    %159 = vector.broadcast %c-1_i32_80 : i32 to vector<1x256xi32>
    %160 = arith.addi %16, %159 : vector<1x256xi32>
    %c16_i32_81 = arith.constant 16 : i32
    %161 = vector.broadcast %c16_i32_81 : i32 to vector<1x256xi32>
    %162 = arith.cmpi slt, %160, %161 : vector<1x256xi32>
    %163 = arith.andi %158, %162 : vector<1x256xi1>
    %cst_82 = arith.constant 0.000000e+00 : f32
    %164 = vector.shape_cast %163 : vector<1x256xi1> to vector<1x256xi1>
    %165 = vector.broadcast %164 : vector<1x256xi1> to vector<8x256xi1>
    %166 = vector.broadcast %cst_82 : f32 to vector<8x256xf32>
    %167 = arith.select %165, %154, %166 : vector<8x256xi1>, vector<8x256xf32>
    %c0_83 = arith.constant 0 : index
    %c17_84 = arith.constant 17 : index
    %168 = vector.load %arg11[%c0_83, %c17_84] : memref<8x384xf32, #tpu.memory_space<vmem>>, vector<8x256xf32>
    %c0_85 = arith.constant 0 : index
    %c18_86 = arith.constant 18 : index
    %169 = vector.load %arg11[%c0_85, %c18_86] : memref<8x384xf32, #tpu.memory_space<vmem>>, vector<8x256xf32>
    %c1_i32_87 = arith.constant 1 : i32
    %170 = vector.broadcast %c1_i32_87 : i32 to vector<1x256xi32>
    %171 = arith.addi %16, %170 : vector<1x256xi32>
    %c0_i32_88 = arith.constant 0 : i32
    %172 = vector.broadcast %c0_i32_88 : i32 to vector<1x256xi32>
    %173 = arith.cmpi sge, %171, %172 : vector<1x256xi32>
    %c1_i32_89 = arith.constant 1 : i32
    %174 = vector.broadcast %c1_i32_89 : i32 to vector<1x256xi32>
    %175 = arith.addi %16, %174 : vector<1x256xi32>
    %c16_i32_90 = arith.constant 16 : i32
    %176 = vector.broadcast %c16_i32_90 : i32 to vector<1x256xi32>
    %177 = arith.cmpi slt, %175, %176 : vector<1x256xi32>
    %178 = arith.andi %173, %177 : vector<1x256xi1>
    %cst_91 = arith.constant 0.000000e+00 : f32
    %179 = vector.shape_cast %178 : vector<1x256xi1> to vector<1x256xi1>
    %180 = vector.broadcast %179 : vector<1x256xi1> to vector<8x256xi1>
    %181 = vector.broadcast %cst_91 : f32 to vector<8x256xf32>
    %182 = arith.select %180, %169, %181 : vector<8x256xi1>, vector<8x256xf32>
    %c0_92 = arith.constant 0 : index
    %c32_93 = arith.constant 32 : index
    %183 = vector.load %arg11[%c0_92, %c32_93] : memref<8x384xf32, #tpu.memory_space<vmem>>, vector<8x256xf32>
    %c-1_i32_94 = arith.constant -1 : i32
    %184 = vector.broadcast %c-1_i32_94 : i32 to vector<1x256xi32>
    %185 = arith.addi %16, %184 : vector<1x256xi32>
    %c0_i32_95 = arith.constant 0 : i32
    %186 = vector.broadcast %c0_i32_95 : i32 to vector<1x256xi32>
    %187 = arith.cmpi sge, %185, %186 : vector<1x256xi32>
    %c-1_i32_96 = arith.constant -1 : i32
    %188 = vector.broadcast %c-1_i32_96 : i32 to vector<1x256xi32>
    %189 = arith.addi %16, %188 : vector<1x256xi32>
    %c16_i32_97 = arith.constant 16 : i32
    %190 = vector.broadcast %c16_i32_97 : i32 to vector<1x256xi32>
    %191 = arith.cmpi slt, %189, %190 : vector<1x256xi32>
    %192 = arith.andi %187, %191 : vector<1x256xi1>
    %cst_98 = arith.constant 0.000000e+00 : f32
    %193 = vector.shape_cast %192 : vector<1x256xi1> to vector<1x256xi1>
    %194 = vector.broadcast %193 : vector<1x256xi1> to vector<8x256xi1>
    %195 = vector.broadcast %cst_98 : f32 to vector<8x256xf32>
    %196 = arith.select %194, %183, %195 : vector<8x256xi1>, vector<8x256xf32>
    %c0_99 = arith.constant 0 : index
    %c33_100 = arith.constant 33 : index
    %197 = vector.load %arg11[%c0_99, %c33_100] : memref<8x384xf32, #tpu.memory_space<vmem>>, vector<8x256xf32>
    %c0_101 = arith.constant 0 : index
    %c34_102 = arith.constant 34 : index
    %198 = vector.load %arg11[%c0_101, %c34_102] : memref<8x384xf32, #tpu.memory_space<vmem>>, vector<8x256xf32>
    %c1_i32_103 = arith.constant 1 : i32
    %199 = vector.broadcast %c1_i32_103 : i32 to vector<1x256xi32>
    %200 = arith.addi %16, %199 : vector<1x256xi32>
    %c0_i32_104 = arith.constant 0 : i32
    %201 = vector.broadcast %c0_i32_104 : i32 to vector<1x256xi32>
    %202 = arith.cmpi sge, %200, %201 : vector<1x256xi32>
    %c1_i32_105 = arith.constant 1 : i32
    %203 = vector.broadcast %c1_i32_105 : i32 to vector<1x256xi32>
    %204 = arith.addi %16, %203 : vector<1x256xi32>
    %c16_i32_106 = arith.constant 16 : i32
    %205 = vector.broadcast %c16_i32_106 : i32 to vector<1x256xi32>
    %206 = arith.cmpi slt, %204, %205 : vector<1x256xi32>
    %207 = arith.andi %202, %206 : vector<1x256xi1>
    %cst_107 = arith.constant 0.000000e+00 : f32
    %208 = vector.shape_cast %207 : vector<1x256xi1> to vector<1x256xi1>
    %209 = vector.broadcast %208 : vector<1x256xi1> to vector<8x256xi1>
    %210 = vector.broadcast %cst_107 : f32 to vector<8x256xf32>
    %211 = arith.select %209, %198, %210 : vector<8x256xi1>, vector<8x256xf32>
    %212 = tpu.concatenate %138, %139, %153, %167, %168, %182, %196, %197, %211 in 0 : vector<8x256xf32>, vector<8x256xf32>, vector<8x256xf32>, vector<8x256xf32>, vector<8x256xf32>, vector<8x256xf32>, vector<8x256xf32>, vector<8x256xf32>, vector<8x256xf32> -> vector<72x256xf32>
    %213 = arith.truncf %212 : vector<72x256xf32> to vector<72x256xbf16>
    %c0_108 = arith.constant 0 : index
    %c0_109 = arith.constant 0 : index
    %214 = vector.load %arg6[%c0_108, %c0_109] : memref<8x72xbf16, #tpu.memory_space<vmem>>, vector<8x72xbf16>
    %cst_110 = arith.constant dense<0.000000e+00> : vector<8x256xf32>
    %215 = tpu.matmul %214, %213, %cst_110 {dimension_numbers = #tpu.dot_dimension_numbers<[1], [0], [0], [1], [0, 0, 1, 1], [], []>} : vector<8x72xbf16>, vector<72x256xbf16>, vector<8x256xf32> -> vector<8x256xf32>
    %c0_111 = arith.constant 0 : index
    %c0_112 = arith.constant 0 : index
    %216 = vector.load %arg7[%c0_111, %c0_112] : memref<8x1xf32, #tpu.memory_space<vmem>>, vector<8x1xf32>
    %217 = vector.broadcast %216 : vector<8x1xf32> to vector<8x256xf32>
    %218 = arith.addf %215, %217 : vector<8x256xf32>
    %cst_113 = arith.constant 0.000000e+00 : f32
    %219 = vector.broadcast %cst_113 : f32 to vector<8x256xf32>
    %220 = arith.maximumf %218, %219 : vector<8x256xf32>
    %c0_114 = arith.constant 0 : index
    %c0_115 = arith.constant 0 : index
    %221 = vector.load %arg8[%c0_114, %c0_115] : memref<8x1xf32, #tpu.memory_space<vmem>>, vector<8x1xf32>
    %222 = vector.broadcast %221 : vector<8x1xf32> to vector<8x256xf32>
    %223 = arith.mulf %220, %222 : vector<8x256xf32>
    %c0_116 = arith.constant 0 : index
    %c0_117 = arith.constant 0 : index
    %224 = vector.load %arg9[%c0_116, %c0_117] : memref<8x1xf32, #tpu.memory_space<vmem>>, vector<8x1xf32>
    %225 = vector.broadcast %224 : vector<8x1xf32> to vector<8x256xf32>
    %226 = arith.addf %223, %225 : vector<8x256xf32>
    %c0_118 = arith.constant 0 : index
    %c0_119 = arith.constant 0 : index
    %227 = vector.load %arg11[%c0_118, %c0_119] : memref<8x384xf32, #tpu.memory_space<vmem>>, vector<8x256xf32>
    tpu.vector_store %arg11[%c0_118, %c0_119], %226 {strides = array<i32>} : memref<8x384xf32, #tpu.memory_space<vmem>>, vector<8x256xf32>,
    %c0_120 = arith.constant 0 : index
    %c1_121 = arith.constant 1 : index
    %228 = vector.load %arg11[%c0_120, %c1_121] : memref<8x384xf32, #tpu.memory_space<vmem>>, vector<8x256xf32>
    %229 = arith.maximumf %226, %228 : vector<8x256xf32>
    %c0_122 = arith.constant 0 : index
    %c16_123 = arith.constant 16 : index
    %230 = vector.load %arg11[%c0_122, %c16_123] : memref<8x384xf32, #tpu.memory_space<vmem>>, vector<8x256xf32>
    %231 = arith.maximumf %229, %230 : vector<8x256xf32>
    %c0_124 = arith.constant 0 : index
    %c17_125 = arith.constant 17 : index
    %232 = vector.load %arg11[%c0_124, %c17_125] : memref<8x384xf32, #tpu.memory_space<vmem>>, vector<8x256xf32>
    %233 = arith.maximumf %231, %232 : vector<8x256xf32>
    %c0_126 = arith.constant 0 : index
    %c0_127 = arith.constant 0 : index
    %c0_128 = arith.constant 0 : index
    %234 = vector.load %arg10[%c0_126, %c0_127, %c0_128] : memref<1x8x256xf32, #tpu.memory_space<vmem>>, vector<1x8x256xf32>
    %235 = vector.shape_cast %234 : vector<1x8x256xf32> to vector<8x256xf32>
    %236 = vector.shape_cast %233 : vector<8x256xf32> to vector<1x8x256xf32>
    tpu.vector_store %arg10[%c0_126, %c0_127, %c0_128], %236 {strides = array<i32>} : memref<1x8x256xf32, #tpu.memory_space<vmem>>, vector<1x8x256xf32>,
    return
  }
  func.func @transform_0(%arg0: i32) -> (i32, i32, i32) {
    %c0_i32 = arith.constant 0 : i32
    %c0_i32_0 = arith.constant 0 : i32
    %c0_i32_1 = arith.constant 0 : i32
    return %arg0, %c0_i32, %c0_i32_0 : i32, i32, i32
  }
  func.func @transform_1(%arg0: i32) -> (i32, i32) {
    %c0_i32 = arith.constant 0 : i32
    %c0_i32_0 = arith.constant 0 : i32
    %c0_i32_1 = arith.constant 0 : i32
    return %c0_i32, %c0_i32_0 : i32, i32
  }
  func.func @transform_2(%arg0: i32) -> (i32, i32) {
    %c0_i32 = arith.constant 0 : i32
    %c0_i32_0 = arith.constant 0 : i32
    %c0_i32_1 = arith.constant 0 : i32
    return %c0_i32, %c0_i32_0 : i32, i32
  }
  func.func @transform_3(%arg0: i32) -> (i32, i32) {
    %c0_i32 = arith.constant 0 : i32
    %c0_i32_0 = arith.constant 0 : i32
    %c0_i32_1 = arith.constant 0 : i32
    return %c0_i32, %c0_i32_0 : i32, i32
  }
  func.func @transform_4(%arg0: i32) -> (i32, i32) {
    %c0_i32 = arith.constant 0 : i32
    %c0_i32_0 = arith.constant 0 : i32
    %c0_i32_1 = arith.constant 0 : i32
    return %c0_i32, %c0_i32_0 : i32, i32
  }
  func.func @transform_5(%arg0: i32) -> (i32, i32) {
    %c0_i32 = arith.constant 0 : i32
    %c0_i32_0 = arith.constant 0 : i32
    %c0_i32_1 = arith.constant 0 : i32
    return %c0_i32, %c0_i32_0 : i32, i32
  }
  func.func @transform_6(%arg0: i32) -> (i32, i32) {
    %c0_i32 = arith.constant 0 : i32
    %c0_i32_0 = arith.constant 0 : i32
    %c0_i32_1 = arith.constant 0 : i32
    return %c0_i32, %c0_i32_0 : i32, i32
  }
  func.func @transform_7(%arg0: i32) -> (i32, i32) {
    %c0_i32 = arith.constant 0 : i32
    %c0_i32_0 = arith.constant 0 : i32
    %c0_i32_1 = arith.constant 0 : i32
    return %c0_i32, %c0_i32_0 : i32, i32
  }
  func.func @transform_8(%arg0: i32) -> (i32, i32) {
    %c0_i32 = arith.constant 0 : i32
    %c0_i32_0 = arith.constant 0 : i32
    %c0_i32_1 = arith.constant 0 : i32
    return %c0_i32, %c0_i32_0 : i32, i32
  }
  func.func @transform_9(%arg0: i32) -> (i32, i32, i32) {
    %c0_i32 = arith.constant 0 : i32
    %c0_i32_0 = arith.constant 0 : i32
    %c0_i32_1 = arith.constant 0 : i32
    return %arg0, %c0_i32, %c0_i32_0 : i32, i32, i32
  }
}

</mosaic_0001>

<bundles_post_ra>
// kernel: tpu_custom_call.1
= control target key start
LH: loop header
LB: loop body
LE: loop exit
PB: predicated region body
PF: predicated region fallthrough
CT: control target
= control target key end

     0   :  { %14 = vsyncpa [#allocation4], 0  ;;  %s1538_s0 = inlined_call_operand.vmem [shape: f32[2,8,256], index: 0, kind: input, shape index: {}]   ;;  %s1539_s1 = inlined_call_operand.vmem [shape: bf16[8,72], index: 1, kind: input, shape index: {}]   ;;  %s1540_s2 = inlined_call_operand.vmem [shape: f32[8,1], index: 2, kind: input, shape index: {}]   ;;  %s1541_s3 = inlined_call_operand.vmem [shape: f32[8,1], index: 3, kind: input, shape index: {}]   ;;  %s1542_s4 = inlined_call_operand.vmem [shape: f32[8,1], index: 4, kind: input, shape index: {}]   ;;  %s1543_s5 = inlined_call_operand.vmem [shape: bf16[8,72], index: 5, kind: input, shape index: {}]   ;;  %s1544_s6 = inlined_call_operand.vmem [shape: f32[8,1], index: 6, kind: input, shape index: {}]   ;;  %s1545_s7 = inlined_call_operand.vmem [shape: f32[8,1], index: 7, kind: input, shape index: {}]   ;;  %s1546_s8 = inlined_call_operand.vmem [shape: f32[8,1], index: 8, kind: input, shape index: {}]   ;;  %s1547_s9 = inlined_call_operand.hbm [shape: f32[2,8,256], index: 9, kind: output, shape index: {}]  }
   0x1   :  { %16 = vsyncpa [#allocation4 + $0x1], 0  ;;  %s1214_s30 = smov 0   ;;  %s1216_s10 = smov 0  }
   0x2   :  { %s1218_s11 = smov 0   ;;  %s1220_s12 = smov 0  }
   0x3 LB: > { %s1235_s13 = sadd.s32 4294967295, %s1150_s12   ;;  %s888_s14 = sadd.s32 4294967294, %s1150_s12   ;;  %s1150_s12 = sphi %s1220_s12, %s1594_s12   ;;  %s1146_s11 = sphi %s1218_s11, %s1593_s11   ;;  %s1142_s10 = sphi %s1216_s10, %s1592_s10   ;;  %s1138_s30 = sphi %s1214_s30, %s1591_s30  }
   0x4   : > { %s1239_s15 = sadd.s32 1, %s1150_s12   ;;  %s223_s16 = sadd.s32 1, %s1146_s11 }
   0x5   : > { %s220_s17 = ssub.s32 %s1150_s12, %s1239_s15  ;;  %p233_p0 = scmp.ne.s32.totalorder %s1146_s11, %s1142_s10 }
   0x6   : > { %p221_p1 = scmp.eq.s32.totalorder %s220_s17, 0  ;;  %p234_p2 = scmp.eq.s32.totalorder %s1235_s13, 1 }
   0x7   : > { %p239_p3 = scmp.ne.s32.totalorder %s1142_s10, %s1138_s30  ;;  %p240_p4 = scmp.eq.s32.totalorder %s888_s14, 1 }
   0x8   : > { %s1250_s18 = scalar_select %p221_p1, %s1146_s11, %s223_s16  }
   0x9   : > { %p1252_p5 = por %p234_p2, %p233_p0  ;;  %p1256_p6 = por %p240_p4, %p239_p3 }
   0xa   : > { %p891_p7 = scmp.ge.s32.totalorder %s1150_s12, 1  ;;  %p290_p8 = scmp.lt.s32.totalorder %s1150_s12, 3 }
   0xc   : > { %p291_p9 = pnand %p891_p7, %p290_p8 }
   0xd   : > { %p326_p10 = scmp.lt.s32.totalorder (!%p291_p9), %s1235_s13, 1  ;;  %s1153_s26 = smov (!%p291_p9), 17  }
   0xe   : > { %294 = sbr.rel (%p291_p9) target bundleno = 999 (0x3e7), region = 56  ;;  %s1552_s27 = smov (!%p291_p9), 110  }
   0xf   : > { %s1155_s28 = smov (!%p291_p9), 96   ;;  %s1156_s29 = smov (!%p291_p9), 94  }
  0x10   : > { %s1157_s14 = smov (!%p291_p9), 111   ;;  %s1158_s16 = smov (!%p291_p9), 95  }
  0x11   : > { %s1159_s17 = smov (!%p291_p9), 126   ;;  %s1576_s23 = smov (!%p291_p9), 127  }
  0x13   : > { %v1152_v0 = vmov 0.0   ;;  %s327_s21 = scalar_select %p326_p10, %s1235_s13, 1  ;;  %vm375_vm0 = vcmask 1047688   ;;  %vm370_vm1 = vcmask 138240   ;;  %v332_v10 = vlaneseq  ;;  %v522_v27 = vld [vmem:[%s1540_s2] sm:$0xff] }
  0x14   : > { %359 = vst [vmem:[#allocation2] sm:$0xff] %v1152_v0  ;;  %vm471_vm3 = vcmask 769024   ;;  %v567_v28 = vld [vmem:[%s1541_s3] sm:$0xff]  ;;  %vm1556_vm5 = vcmask 1043456   ;;  %vm1555_vm6 = vcmask 777216   ;;  %v1162_v30 = vmov 0  }
  0x15   : > { %361 = vst [vmem:[#allocation2 + $0x10] sm:$0xff] %v1152_v0  ;;  %s952_s22 = sshll.u32 %s327_s21, 4  ;;  %s1550_s21 = smov 112   ;;  %v333_v12 = vand.u32 127, %v332_v10  ;;  %1045 = vset.pattern.permute.xlu0 %v1162_v30  ;;  %1046 = vset.pattern.permute.xlu1 %v1162_v30  ;;  %v575_v31 = vld [vmem:[%s1542_s4] sm:$0xff]  ;;  %vm1554_vm8 = vcmask 785408  }
  0x16   : > { %s330_s25 = scalar_lea.vmem %s1538_s0, %s952_s22  ;;  %s1548_s22 = smov 127   ;;  %1047 = vset.pattern.permute.xlu2 %v1162_v30  ;;  %vm1163_vm10 = vmmov 1   ;;  %vm445_vm13 = vcmask 900096   ;;  %vm1558_vm14 = vcmask 908288   ;;  %vm1557_vm15 = vcmask 1031168  }
  0x17   : > { %v362_v1 = vld [vmem:[%s330_s25] sm:$0xff]  ;;  %v363_v2 = vld [vmem:[%s330_s25 + $0x8] sm:$0xff]  ;;  %v334_v15 = vadd.s32 128, %v333_v12  ;;  %v339_v17 = vand.u32 15, %v333_v12 }
  0x18   : > { %366 = vrot.lane.b32.xlu0 %v362_v1, %s1153_s26  ;;  %v521_v30 = vld [vmem:[%s1539_s1] sm:$0xf] }
  0x19   : > { %v346_v18 = vand.u32 15, %v334_v15  ;;  %v1298_v20 = vadd.s32 1, %v339_v17  ;;  %v1304_v26 = vadd.s32 4294967295, %v339_v17 }
  0x1b   : > { %v1300_v21 = vadd.s32 1, %v346_v18  ;;  %vm402_vm2 = vcmp.lt.s32.totalorder %v1298_v20, 16  ;;  %v1312_v29 = vadd.s32 4294967295, %v346_v18  ;;  %vm383_vm7 = vcmp.ge.s32.totalorder %v1304_v26, 0 }
  0x1c   : > { %vm1332_vm11 = vmpackc.low %vm1163_vm10, %vm383_vm7 }
  0x1d   : > { %vm403_vm4 = vcmp.lt.s32.totalorder %v1300_v21, 16  ;;  %vm384_vm9 = vcmp.ge.s32.totalorder %v1312_v29, 0 }
  0x1e   : > { %vm1341_vm12 = vmpackc.low %vm1163_vm10, %vm384_vm9 }
  0x20   : > { %368 = vrot.lane.b32.xlu0 %v363_v2, %s1153_s26 }
  0x8a   : > { %v367_v3 = vpop.permute.xlu0 %366 }
  0x8b   : > { %376 = vst.msk [vmem:[#allocation2] sm:$0xff] %vm375_vm0, %v367_v3 }
  0x92   : > { %v369_v4 = vpop.permute.xlu0 %368  ;;  %v1277_v7 = vld [vmem:[#allocation2] sm:$0xff] }
  0x93   : > { %378 = vst.msk [vmem:[#allocation2 + $0x10] sm:$0xff] %vm370_vm1, %v369_v4  ;;  %v1275_v6 = vsel %vm370_vm1, %v367_v3, %v369_v4 }
  0x94   : > { %v1015_v8 = vpack.i.bf16 %v1275_v6, %v1277_v7 }
  0x9a   : > { %v397_v5 = vld [vmem:[#allocation2 + $0x10] sm:$0xff] }
  0x9b   : > { %443 = vrot.lane.b32.xlu0 %v397_v5, %s1552_s27  ;;  %456 = vrot.lane.b32.xlu2 %v397_v5, %s1155_s28 }
  0x9c   : > { %469 = vrot.lane.b32.xlu1 %v397_v5, %s1156_s29 }
  0xa3   : > { %493 = vrot.lane.b32.xlu2 %v397_v5, %s1157_s14  ;;  %1016 = vrot.lane.b32.xlu0 %v1015_v8, %s1158_s16 }
  0xa4   : > { %504 = vrot.lane.b32.xlu1 %v397_v5, %s1158_s16 }
  0xab   : > { %1031 = vrot.lane.b32.xlu0 %v1015_v8, %s1159_s17  ;;  %1011 = vrot.lane.b32.xlu2 %v1015_v8, %s1155_s28 }
  0xac   : > { %1006 = vrot.lane.b32.xlu1 %v1015_v8, %s1156_s29 }
  0xb3   : > { %430 = vrot.lane.b32.xlu0 %v397_v5, %s1550_s21  ;;  %1021 = vrot.lane.b32.xlu2 %v1015_v8, %s1552_s27 }
  0xb4   : > { %417 = vrot.lane.b32.xlu1 %v397_v5, %s1159_s17 }
  0xbb   : > { %1036 = vrot.lane.b32.xlu2 %v1015_v8, %s1550_s21  ;;  %525 = vperm.xlu0 %1045, %v522_v27  }
  0xbc   : > { %1026 = vrot.lane.b32.xlu1 %v1015_v8, %s1157_s14 }
  0xc3   : > { %482 = vrot.lane.b32.xlu2 %v397_v5, %s1548_s22 }
  0xc4   : > { %1041 = vrot.lane.b32.xlu1 %v1015_v8, %s1548_s22  ;;  %s1574_s22 = smov 110  }
  0xcb   : > { %578 = vperm.xlu2 %1047, %v575_v31  }
  0xcc   : > { %570 = vperm.xlu1 %1046, %v567_v28  }
  0xf5   : > { %v457_v9 = vpop.permute.xlu2 %456 }
  0xfd   : > { %v1294_v13 = vpop.permute.xlu2 %493 }
 0x105   : > { %v1012_v19 = vpop.permute.xlu2 %1011 }
 0x106   : > { %v1014_v36 = vunpack.i.h.bf16 %v1012_v19  ;;  %v1013_v37 = vunpack.i.l.bf16 %v1012_v19 }
 0x108   : > { %v459_v50 = vsel %vm1554_vm8, %v1013_v37, %v1014_v36  ;;  %v460_v51 = vsel %vm1554_vm8, %v1014_v36, %v457_v9  ;;  %vm1353_vm8 = vmpackc.low %vm402_vm2, %vm1163_vm10 }
 0x10d   : > { %v1296_v14 = vpop.permute.xlu0 %443  ;;  %v1022_v42 = vpop.permute.xlu2 %1021 }
 0x10e   : > { %v470_v11 = vpop.permute.xlu1 %469  ;;  %v1024_v55 = vunpack.i.h.bf16 %v1022_v42  ;;  %v1023_v56 = vunpack.i.l.bf16 %v1022_v42 }
 0x110   : > { %v446_v0 = vsel %vm445_vm13, %v1023_v56, %v1024_v55  ;;  %v447_v2 = vsel %vm445_vm13, %v1024_v55, %v1296_v14 }
 0x115   : > { %v1017_v22 = vpop.permute.xlu0 %1016  ;;  %v1037_v57 = vpop.permute.xlu2 %1036 }
 0x116   : > { %v505_v16 = vpop.permute.xlu1 %504  ;;  %v1019_v32 = vunpack.i.h.bf16 %v1017_v22  ;;  %v1018_v33 = vunpack.i.l.bf16 %v1017_v22  ;;  %v1039_v3 = vunpack.i.h.bf16 %v1037_v57  ;;  %v1038_v4 = vunpack.i.l.bf16 %v1037_v57 }
 0x118   : > { %v507_v45 = vsel %vm1555_vm6, %v1018_v33, %v1019_v32  ;;  %v508_v46 = vsel %vm1555_vm6, %v1019_v32, %v505_v16  ;;  %vm1365_vm6 = vmpackc.low %vm403_vm4, %vm1163_vm10 }
 0x119   : > { %v896_v53 = vpack.c.bf16 %v507_v45, %v459_v50  ;;  %v909_v54 = vpack.c.bf16 %v508_v46, %v460_v51  ;;  %vm1380_vm10 = vmpackc.low %vm383_vm7, %vm402_vm2  ;;  %vm1559_vm7 = vcmask 588800   ;;  %v707_v51 = vld [vmem:[%s1544_s6] sm:$0xff] }
 0x11d   : > { %v1032_v47 = vpop.permute.xlu0 %1031 }
 0x11e   : > { %v1007_v23 = vpop.permute.xlu1 %1006  ;;  %v1034_v59 = vunpack.i.h.bf16 %v1032_v47  ;;  %v1033_v60 = vunpack.i.l.bf16 %v1032_v47 }
 0x11f   : > { %v1009_v24 = vunpack.i.h.bf16 %v1007_v23  ;;  %v1008_v25 = vunpack.i.l.bf16 %v1007_v23 }
 0x120   : > { %v420_v15 = vsel %vm1557_vm15, %v1033_v60, %v1034_v59 }
 0x121   : > { %v472_v34 = vsel %vm471_vm3, %v1008_v25, %v1009_v24  ;;  %v473_v35 = vsel %vm471_vm3, %v1009_v24, %v470_v11  ;;  %v483_v25 = vpop.permute.xlu2 %482 }
 0x122   : > { %v476_v38 = vsel %vm402_vm2, %v472_v34, 0.0  ;;  %v477_v39 = vsel %vm403_vm4, %v473_v35, 0.0 }
 0x123   : > { %v519_v40 = vpack.c.bf16 %v476_v38, %v476_v38  ;;  %v520_v41 = vpack.c.bf16 %v477_v39, %v477_v39 }
 0x125   : > { %v534_v43 = vsel %vm1556_vm5, %v519_v40, 0  ;;  %v537_v44 = vsel %vm1556_vm5, %v520_v41, 0  ;;  %v431_v63 = vpop.permute.xlu0 %430  ;;  %vm432_vm5 = vcmask 916480  }
 0x126   : > { %v418_v48 = vpop.permute.xlu1 %417  ;;  %542 = vmatpush.bf16.msra.mxu0 %v534_v43  ;;  %555 = vmatpush.bf16.msra.mxu1 %v537_v44  ;;  %v434_v12 = vsel %vm432_vm5, %v1039_v3, %v431_v63  ;;  %v433_v16 = vsel %vm432_vm5, %v1038_v4, %v1039_v3 }
 0x127   : > { %v421_v14 = vsel %vm1557_vm15, %v1034_v59, %v418_v48  ;;  %vm1389_vm15 = vmpackc.low %vm384_vm9, %vm403_vm4  ;;  %v902_v22 = vpack.c.bf16 %v433_v16, %v420_v15  ;;  %vm1579_vm9 = vcmask 777216  }
 0x128   : > { %v915_v18 = vpack.c.bf16 %v434_v12, %v421_v14 }
 0x129   : > { %v579_v37 = vpop.permute.xlu2 %578 }
 0x12a   : > { %897 = vmatpush.bf16.msk.msra.mxu0 %vm1332_vm11, %v896_v53  ;;  %910 = vmatpush.bf16.msk.msra.mxu1 %vm1341_vm12, %v909_v54  ;;  %v750_v53 = vld [vmem:[%s1545_s7] sm:$0xff] }
 0x12b   : > { %v758_v54 = vld [vmem:[%s1546_s8] sm:$0xff] }
 0x12d   : > { %v526_v31 = vpop.permute.xlu0 %525 }
 0x12e   : > { %v1027_v58 = vpop.permute.xlu1 %1026 }
 0x12f   : > { %v1029_v61 = vunpack.i.h.bf16 %v1027_v58  ;;  %v1028_v62 = vunpack.i.l.bf16 %v1027_v58 }
 0x131   : > { %v496_v5 = vsel %vm1558_vm14, %v1028_v62, %v1029_v61  ;;  %v497_v8 = vsel %vm1558_vm14, %v1029_v61, %v1294_v13  ;;  %vm484_vm14 = vcmask 1039360  }
 0x132   : > { %v899_v10 = vpack.c.bf16 %v446_v0, %v496_v5  ;;  %v912_v11 = vpack.c.bf16 %v447_v2, %v497_v8 }
 0x134   : > { %900 = vmatpush.bf16.msk.msra.mxu0 %vm1353_vm8, %v899_v10  ;;  %913 = vmatpush.bf16.msk.msra.mxu1 %vm1365_vm6, %v912_v11 }
 0x136   : > { %v1042_v19 = vpop.permute.xlu1 %1041 }
 0x137   : > { %v1044_v23 = vunpack.i.h.bf16 %v1042_v19  ;;  %v1043_v24 = vunpack.i.l.bf16 %v1042_v19 }
 0x138   : > { %903 = vmatpush.bf16.msk.msra.mxu0 %vm1380_vm10, %v902_v22  ;;  %916 = vmatpush.bf16.msk.msra.mxu1 %vm1389_vm15, %v915_v18 }
 0x139   : > { %v485_v26 = vsel %vm484_vm14, %v1043_v24, %v1044_v23  ;;  %v486_v27 = vsel %vm484_vm14, %v1044_v23, %v483_v25 }
 0x13a   : > { %v905_v28 = vpack.c.bf16 %v485_v26, %v1277_v7  ;;  %v918_v29 = vpack.c.bf16 %v486_v27, %v1275_v6 }
 0x13c   : > { %906 = vmatpush.bf16.msk.msra.mxu0 %vm1332_vm11, %v905_v28  ;;  %919 = vmatpush.bf16.msk.msra.mxu1 %vm1341_vm12, %v918_v29 }
 0x13e   : > { %v571_v34 = vpop.permute.xlu1 %570 }
 0x13f   : > { %907 = vmatmul.msk.bf16.vlgmr.msra.gmra.mxu0 %vm1559_vm7, %v521_v30  ;;  %920 = vmatmul.msk.bf16.vlgmr.msra.gmra.mxu1 %vm1559_vm7, %v521_v30  ;;  %vm1580_vm7 = vmmov %vm1579_vm9 }
 0x1bc   : > { %v548_v32 = vpop.f32.mrf.mxu0  ;;  %v561_v7 = vpop.f32.mrf.mxu1 }
 0x1bd   : > { %v549_v33 = vadd.f32 %v548_v32, %v526_v31  ;;  %v562_v6 = vadd.f32 %v561_v7, %v526_v31 }
 0x1bf   : > { %v565_v35 = vmax.f32 %v549_v33, 0.0  ;;  %v566_v36 = vmax.f32 %v562_v6, 0.0 }
 0x1c1   : > { %v573_v38 = vmul.f32 %v571_v34, %v565_v35  ;;  %v574_v39 = vmul.f32 %v571_v34, %v566_v36 }
 0x1c3   : > { %v581_v40 = vadd.f32 %v579_v37, %v573_v38  ;;  %v582_v41 = vadd.f32 %v579_v37, %v574_v39 }
 0x1c4   : > { %v550_v42 = vpop.f32.mrf.mxu0  ;;  %v563_v43 = vpop.f32.mrf.mxu1 }
 0x1c5   : > { %585 = vrot.lane.b32.xlu1 %v581_v40, %s1153_s26  ;;  %587 = vrot.lane.b32.xlu2 %v582_v41, %s1153_s26  ;;  %s1575_s26 = smov 112  }
 0x21f   : > { %v588_v44 = vpop.permute.xlu2 %587 }
 0x220   : > { %595 = vst.msk [vmem:[#allocation2 + $0x10] sm:$0xff] %vm370_vm1, %v588_v44 }
 0x227   : > { %v602_v45 = vld [vmem:[#allocation2 + $0x10] sm:$0xff] }
 0x228   : > { %690 = vrot.lane.b32.xlu2 %v602_v45, %s1158_s16  ;;  %646 = vrot.lane.b32.xlu0 %v602_v45, %s1155_s28 }
 0x229   : > { %658 = vrot.lane.b32.xlu1 %v602_v45, %s1156_s29 }
 0x230   : > { %610 = vrot.lane.b32.xlu2 %v602_v45, %s1159_s17  ;;  %680 = vrot.lane.b32.xlu0 %v602_v45, %s1157_s14 }
 0x231   : > { %634 = vrot.lane.b32.xlu1 %v602_v45, %s1574_s22 }
 0x237   : > { %v586_v46 = vpop.permute.xlu1 %585 }
 0x238   : > { %593 = vst.msk [vmem:[#allocation2] sm:$0xff] %vm375_vm0, %v586_v46  ;;  %v1421_v47 = vsel %vm370_vm1, %v586_v46, %v588_v44  ;;  %vm1577_vm0 = vcmask 1043456  }
 0x239   : > { %vm1578_vm1 = vmmov %vm1577_vm0 }
 0x23f   : > { %v1423_v48 = vld [vmem:[#allocation2] sm:$0xff] }
 0x240   : > { %v1058_v50 = vpack.i.bf16 %v1421_v47, %v1423_v48 }
 0x242   : > { %1059 = vrot.lane.b32.xlu1 %v1058_v50, %s1158_s16  ;;  %1054 = vrot.lane.b32.xlu2 %v1058_v50, %s1155_s28 }
 0x243   : > { %1049 = vrot.lane.b32.xlu0 %v1058_v50, %s1156_s29 }
 0x24a   : > { %1074 = vrot.lane.b32.xlu1 %v1058_v50, %s1159_s17  ;;  %1069 = vrot.lane.b32.xlu2 %v1058_v50, %s1157_s14 }
 0x24b   : > { %1064 = vrot.lane.b32.xlu0 %v1058_v50, %s1574_s22  ;;  %s323_s22 = sand.u32 1, %s1142_s10  }
 0x252   : > { %622 = vrot.lane.b32.xlu1 %v602_v45, %s1575_s26  ;;  %1084 = vrot.lane.b32.xlu2 %v1058_v50, %s1576_s23 }
 0x253   : > { %1079 = vrot.lane.b32.xlu0 %v1058_v50, %s1575_s26 }
 0x25a   : > { %710 = vperm.xlu1 %1046, %v707_v51   ;;  %753 = vperm.xlu2 %1047, %v750_v53  }
 0x25b   : > { %670 = vrot.lane.b32.xlu0 %v602_v45, %s1576_s23 }
 0x263   : > { %761 = vperm.xlu0 %1045, %v758_v54  }
 0x26b   : > { %778 = vrot.lane.b32.xlu0 %v602_v45, %s1576_s23 }
 0x273   : > { %790 = vrot.lane.b32.xlu0 %v602_v45, %s1575_s26 }
 0x27b   : > { %802 = vrot.lane.b32.xlu0 %v602_v45, %s1157_s14 }
 0x282   : > { %v691_v55 = vpop.permute.xlu2 %690 }
 0x28a   : > { %v611_v58 = vpop.permute.xlu2 %610 }
 0x29a   : > { %v647_v57 = vpop.permute.xlu0 %646 }
 0x29b   : > { %v659_v56 = vpop.permute.xlu1 %658 }
 0x29c   : > { %v1055_v61 = vpop.permute.xlu2 %1054 }
 0x29d   : > { %v1057_v10 = vunpack.i.h.bf16 %v1055_v61  ;;  %v1056_v11 = vunpack.i.l.bf16 %v1055_v61 }
 0x2a2   : > { %v681_v60 = vpop.permute.xlu0 %680 }
 0x2a3   : > { %v635_v59 = vpop.permute.xlu1 %634 }
 0x2a4   : > { %v1070_v12 = vpop.permute.xlu2 %1069 }
 0x2a5   : > { %v1072_v21 = vunpack.i.h.bf16 %v1070_v12  ;;  %v1071_v28 = vunpack.i.l.bf16 %v1070_v12 }
 0x2ac   : > { %v1085_v35 = vpop.permute.xlu2 %1084 }
 0x2ad   : > { %v1087_v41 = vunpack.i.h.bf16 %v1085_v35  ;;  %v1086_v42 = vunpack.i.l.bf16 %v1085_v35 }
 0x2af   : > { %v672_v1 = vsel %vm484_vm14, %v1086_v42, %v1087_v41 }
 0x2b4   : > { %v1060_v62 = vpop.permute.xlu1 %1059 }
 0x2b5   : > { %v1050_v63 = vpop.permute.xlu0 %1049  ;;  %v1062_v3 = vunpack.i.h.bf16 %v1060_v62  ;;  %v1061_v4 = vunpack.i.l.bf16 %v1060_v62  ;;  %v754_v62 = vpop.permute.xlu2 %753 }
 0x2b6   : > { %v1052_v0 = vunpack.i.h.bf16 %v1050_v63  ;;  %v1051_v2 = vunpack.i.l.bf16 %v1050_v63 }
 0x2b7   : > { %v692_v23 = vsel %vm1579_vm9, %v1061_v4, %v1062_v3  ;;  %v693_v24 = vsel %vm1580_vm7, %v1062_v3, %v691_v55 }
 0x2b8   : > { %v660_v5 = vsel %vm471_vm3, %v1051_v2, %v1052_v0  ;;  %v661_v8 = vsel %vm471_vm3, %v1052_v0, %v659_v56  ;;  %vm1581_vm3 = vcmask 785408   ;;  %v931_v56 = vpack.c.bf16 %v672_v1, %v1423_v48 }
 0x2b9   : > { %v664_v14 = vsel %vm402_vm2, %v660_v5, 0.0  ;;  %v665_v15 = vsel %vm403_vm4, %v661_v8, 0.0  ;;  %v648_v20 = vsel %vm1581_vm3, %v1056_v11, %v1057_v10  ;;  %vm1582_vm2 = vmmov %vm1581_vm3  ;;  %vm1583_vm4 = vcmask 908288  }
 0x2ba   : > { %v704_v16 = vpack.c.bf16 %v664_v14, %v664_v14  ;;  %v705_v18 = vpack.c.bf16 %v665_v15, %v665_v15  ;;  %v649_v27 = vsel %vm1582_vm2, %v1057_v10, %v647_v57  ;;  %v922_v31 = vpack.c.bf16 %v692_v23, %v648_v20  ;;  %vm1584_vm7 = vmmov %vm1583_vm4 }
 0x2bb   : > { %v935_v32 = vpack.c.bf16 %v693_v24, %v649_v27  ;;  %v682_v6 = vsel %vm1583_vm4, %v1071_v28, %v1072_v21  ;;  %v683_v34 = vsel %vm1584_vm7, %v1072_v21, %v681_v60 }
 0x2bc   : > { %v717_v19 = vsel %vm1577_vm0, %v704_v16, 0  ;;  %v720_v22 = vsel %vm1578_vm1, %v705_v18, 0  ;;  %v1075_v25 = vpop.permute.xlu1 %1074 }
 0x2bd   : > { %v1065_v26 = vpop.permute.xlu0 %1064  ;;  %725 = vmatpush.bf16.msra.mxu2 %v717_v19  ;;  %738 = vmatpush.bf16.msra.mxu3 %v720_v22  ;;  %v1077_v38 = vunpack.i.h.bf16 %v1075_v25  ;;  %v1076_v39 = vunpack.i.l.bf16 %v1075_v25 }
 0x2be   : > { %v1067_v29 = vunpack.i.h.bf16 %v1065_v26  ;;  %v1066_v30 = vunpack.i.l.bf16 %v1065_v26 }
 0x2c0   : > { %v636_v7 = vsel %vm445_vm13, %v1066_v30, %v1067_v29  ;;  %v637_v33 = vsel %vm445_vm13, %v1067_v29, %v635_v59  ;;  %vm1585_vm13 = vcmask 1031168  }
 0x2c1   : > { %923 = vmatpush.bf16.msk.msra.mxu2 %vm1332_vm11, %v922_v31  ;;  %936 = vmatpush.bf16.msk.msra.mxu3 %vm1341_vm12, %v935_v32  ;;  %v925_v36 = vpack.c.bf16 %v636_v7, %v682_v6  ;;  %v938_v37 = vpack.c.bf16 %v637_v33, %v683_v34  ;;  %v612_v46 = vsel %vm1585_vm13, %v1076_v39, %v1077_v38  ;;  %vm1586_vm0 = vmmov %vm1585_vm13 }
 0x2c2   : > { %v613_v51 = vsel %vm1586_vm0, %v1077_v38, %v611_v58  ;;  %v706_v58 = vld [vmem:[%s1543_s5] sm:$0xf] }
 0x2c4   : > { %v623_v45 = vpop.permute.xlu1 %622 }
 0x2c5   : > { %v1080_v40 = vpop.permute.xlu0 %1079  ;;  %926 = vmatpush.bf16.msk.msra.mxu2 %vm1353_vm8, %v925_v36  ;;  %939 = vmatpush.bf16.msk.msra.mxu3 %vm1365_vm6, %v938_v37  ;;  %vm1587_vm6 = vcmask 588800  }
 0x2c6   : > { %v1082_v43 = vunpack.i.h.bf16 %v1080_v40  ;;  %v1081_v44 = vunpack.i.l.bf16 %v1080_v40  ;;  %vm1588_vm8 = vmmov %vm1587_vm6 }
 0x2c8   : > { %v624_v50 = vsel %vm432_vm5, %v1081_v44, %v1082_v43  ;;  %v625_v53 = vsel %vm432_vm5, %v1082_v43, %v623_v45 }
 0x2c9   : > { %v928_v54 = vpack.c.bf16 %v624_v50, %v612_v46  ;;  %v941_v55 = vpack.c.bf16 %v625_v53, %v613_v51 }
 0x2cb   : > { %929 = vmatpush.bf16.msk.msra.mxu2 %vm1380_vm10, %v928_v54  ;;  %942 = vmatpush.bf16.msk.msra.mxu3 %vm1389_vm15, %v941_v55 }
 0x2cc   : > { %v711_v13 = vpop.permute.xlu1 %710 }
 0x2cd   : > { %v671_v9 = vpop.permute.xlu0 %670 }
 0x2ce   : > { %v673_v57 = vsel %vm484_vm14, %v1087_v41, %v671_v9 }
 0x2cf   : > { %v944_v59 = vpack.c.bf16 %v673_v57, %v1421_v47  ;;  %932 = vmatpush.bf16.msk.msra.mxu2 %vm1332_vm11, %v931_v56  ;;  %vm1589_vm11 = vmmov %vm1583_vm4 }
 0x2d1   : > { %945 = vmatpush.bf16.msk.msra.mxu3 %vm1341_vm12, %v944_v59  ;;  %vm1590_vm12 = vmmov %vm1583_vm4 }
 0x2d2   : > { %933 = vmatmul.msk.bf16.vlgmr.msra.gmra.mxu2 %vm1587_vm6, %v706_v58 }
 0x2d4   : > { %946 = vmatmul.msk.bf16.vlgmr.msra.gmra.mxu3 %vm1588_vm8, %v706_v58 }
 0x2d5   : > { %v762_v0 = vpop.permute.xlu0 %761 }
 0x2dd   : > { %v779_v8 = vpop.permute.xlu0 %778 }
 0x2e5   : > { %v791_v11 = vpop.permute.xlu0 %790 }
 0x2ed   : > { %v803_v18 = vpop.permute.xlu0 %802 }
 0x355   : > { %v731_v17 = vpop.f32.mrf.mxu2 }
 0x356   : > { %v732_v48 = vadd.f32 %v731_v17, %v711_v13 }
 0x357   : > { %v744_v60 = vpop.f32.mrf.mxu3 }
 0x358   : > { %v748_v61 = vmax.f32 %v732_v48, 0.0  ;;  %v745_v47 = vadd.f32 %v744_v60, %v711_v13 }
 0x35a   : > { %v756_v49 = vmul.f32 %v754_v62, %v748_v61  ;;  %v749_v63 = vmax.f32 %v745_v47, 0.0 }
 0x35c   : > { %v764_v2 = vadd.f32 %v762_v0, %v756_v49  ;;  %v757_v3 = vmul.f32 %v754_v62, %v749_v63 }
 0x35d   : > { %v733_v4 = vpop.f32.mrf.mxu2 }
 0x35e   : > { %766 = vst [vmem:[#allocation2] sm:$0xff] %v764_v2  ;;  %v765_v52 = vadd.f32 %v762_v0, %v757_v3  ;;  %774 = vrot.lane.b32.xlu1 %v764_v2, %s1576_s23 }
 0x35f   : > { %v746_v5 = vpop.f32.mrf.mxu3 }
 0x360   : > { %776 = vrot.lane.b32.xlu2 %v765_v52, %s1576_s23  ;;  %s892_s23 = sshll.u32 %s323_s22, 4 }
 0x366   : > { %786 = vrot.lane.b32.xlu1 %v764_v2, %s1575_s26 }
 0x368   : > { %788 = vrot.lane.b32.xlu2 %v765_v52, %s1575_s26  ;;  %s325_s26 = scalar_lea.vmem [#allocation3], %s892_s23 }
 0x369   : > { %s826_s28 = sshll.u32 %s325_s26, 4  ;;  %s827_s28 = int_to_ptr.vmem [resolvable:$true] %s826_s28 }
 0x36e   : > { %798 = vrot.lane.b32.xlu1 %v764_v2, %s1157_s14 }
 0x370   : > { %800 = vrot.lane.b32.xlu2 %v765_v52, %s1157_s14  ;;  %s953_s14 = sshll.u32 %s1235_s13, 4  ;;  %s813_s13 = scalar_lea.sflag [#allocation4], %s323_s22 }
 0x371   : > { %s824_s16 = scalar_lea.hbm %s1547_s9, %s953_s14  ;;  %s1108_s14 = scalar_lea.hbm %s1547_s9, 32 }
 0x372   : > { %s828_s29 = sshll.u32 %s824_s16, 4  ;;  %s829_s29 = int_to_ptr.hbm [resolvable:$true] %s828_s29 }
 0x373   : > { %s1102_s17 = sshra.s32 %s829_s29, 4  ;;  %s1103_s17 = int_to_ptr.hbm [resolvable:$true] %s1102_s17 }
 0x374   : > { %s1104_s27 = scalar_lea.hbm %s1103_s17, 16  ;;  %p1109_p0 = scmp.lt.s32.totalorder %s1103_s17, %s1547_s9 }
 0x375   : > { %p1105_p11 = scmp.ne.s32.totalorder %s1103_s17, %s1104_s27  ;;  %p1110_p1 = scmp.lt.s32.totalorder %s1108_s14, %s1104_s27 }
 0x377   : > { %p1106_p12 = pnand %p1105_p11, %p1252_p5  ;;  %p1111_p2 = por %p1110_p1, %p1109_p0 }
 0x379   : > { %p1107_p13 = pneg %p1106_p12 }
 0x37b   : > { %p1112_p3 = pnand %p1111_p2, %p1107_p13 }
 0x3ba   : > { %v777_v10 = vpop.permute.xlu2 %776 }
 0x3bb   : > { %v781_v14 = vsel %vm484_vm14, %v777_v10, %v779_v8 }
 0x3bc   : > { %v785_v16 = vmax.f32 %v765_v52, %v781_v14 }
 0x3c2   : > { %v789_v12 = vpop.permute.xlu2 %788 }
 0x3c3   : > { %v793_v15 = vsel %vm432_vm5, %v789_v12, %v791_v11 }
 0x3c4   : > { %v797_v19 = vmax.f32 %v785_v16, %v793_v15 }
 0x3ca   : > { %v801_v22 = vpop.permute.xlu2 %800 }
 0x3cb   : > { %v805_v23 = vsel %vm1589_vm11, %v801_v22, %v803_v18 }
 0x3cc   : > { %v809_v24 = vmax.f32 %v797_v19, %v805_v23 }
 0x3ce   : > { %811 = vst [vmem:[%s325_s26 + $0x8] sm:$0xff] %v809_v24 }
 0x3d0   : > { %v775_v25 = vpop.permute.xlu1 %774 }
 0x3d1   : > { %v780_v20 = vsel %vm484_vm14, %v775_v25, %v777_v10 }
 0x3d2   : > { %v784_v21 = vmax.f32 %v764_v2, %v780_v20 }
 0x3d8   : > { %v787_v26 = vpop.permute.xlu1 %786 }
 0x3d9   : > { %v792_v27 = vsel %vm432_vm5, %v787_v26, %v789_v12 }
 0x3da   : > { %v796_v28 = vmax.f32 %v784_v21, %v792_v27 }
 0x3e0   : > { %v799_v29 = vpop.permute.xlu1 %798 }
 0x3e1   : > { %v804_v30 = vsel %vm1590_vm12, %v799_v29, %v801_v22 }
 0x3e2   : > { %v808_v31 = vmax.f32 %v796_v28, %v804_v30 }
 0x3e4   : > { %810 = vst [vmem:[%s325_s26] sm:$0xff] %v808_v31 }
 0x3e5   : > { %1115 = shalt.err (!%p1112_p3)
}
 0x3e6   : > { %954 = dma.vmem_to_hbm [thread:$0]  (%p1252_p5), %s827_s28, 256, %s829_s29, %s813_s13  }
 0x3e7 PF: > { %p960_p4 = scmp.ge.s32.totalorder %s1150_s12, 2  ;;  %s840_s22 = sand.u32 1, %s1138_s30  }
 0x3e8   : > { %s841_s26 = scalar_lea.sflag [#allocation4], %s840_s22 }
 0x3e9   : > { %p957_p7 = pnand %p960_p4, %p1256_p6 }
 0x3eb   : > { %p958_p8 = pneg %p957_p7 }
 0x3ed   : > { %1133 = dma.done.wait (%p958_p8), %s841_s26, 256  }
 0x3ee   : > { %1135 = vsyncadd (%p958_p8), %s841_s26, 4294967040  ;;  %p19_p9 = scmp.ge.s32.totalorder %s1239_s15, 4   ;;  %s1591_s30 = smov %s1142_s10 }
 0x3ef   : > { %s1592_s10 = smov %s1146_s11  ;;  %s1593_s11 = smov %s1250_s18 }
 0x3f0   : > { %s1594_s12 = smov %s1239_s15  ;;  %21 = sbr.rel (!%p19_p9) target bundleno = 3 (0x3), region = 91 }
 0x3f5   :  { %847 = vsyncpa [#allocation4], 1 }
 0x3f6   :  { %849 = vsyncpa [#allocation4 + $0x1], 1 }

</bundles_post_ra>
